<compile_context>
chip_gen: v7x
topology: tpu7x:2x2x1
jax: 0.10.0
libtpu: 0.0.40
codegen_flags: <defaults>
</compile_context>

<pallas_src>
import functools

import jax
import jax.numpy as jnp
from jax.experimental import pallas as pl
from jax.experimental.pallas import tpu as pltpu


# ----------------------------------------------------------------------------
# Small helpers: constant div/mod with power-of-two strength reduction.
# ----------------------------------------------------------------------------
def _div_c(x, d):
    if d & (d - 1) == 0:
        return x >> (d.bit_length() - 1)
    return x // d


def _mod_c(x, d):
    if d & (d - 1) == 0:
        return x & (d - 1)
    return x % d


def _default_num_strips(n):
    """1 strip on single-TensorCore chips (v5e/v6e), up to 2 on dual-TC chips."""
    try:
        kind = jax.devices()[0].device_kind.lower()
    except Exception:  # pragma: no cover - defensive
        kind = ""
    single_tc = any(t in kind for t in ("v5e", "v5 lite", "v6e", "v6 lite"))
    strips = 1 if single_tc else min(n, 2)
    while strips > 1 and n % strips:
        strips -= 1
    return max(strips, 1)


# ----------------------------------------------------------------------------
# Fused kernel.  All activations are (C, L): channels on sublanes, the flattened
# spatial extent of `ipb` images (L = ipb*H*W) on lanes.
# ----------------------------------------------------------------------------
def _bottleneck_kernel(x_ref, p1_ref, p2_ref, o_ref, patches_ref, *,
                       H, W, ipb, cin, cb, se, cout, wb_off):
    M = H * W
    L = ipb * M

    # ---- unpack the two packed parameter slabs (static slices; wb lane-group aligned) ----
    o = 0
    wa = p1_ref[:, o:o + cin];   o += cin        # (cb, cin)  1x1 conv A (BN scale folded)
    wse1 = p1_ref[:, o:o + se];  o += se         # (cb, se)   SE squeeze weights
    wse2t = p1_ref[:, o:o + se]; o += se         # (cb, se)   SE expand weights (transposed)
    ba = p1_ref[:, o:o + 1];     o += 1          # (cb, 1)
    bb = p1_ref[:, o:o + 1];     o += 1          # (cb, 1)
    bse2 = p1_ref[:, o:o + 1];   o += 1          # (cb, 1)
    bse1 = p1_ref[0:1, o:o + se]                 # (1, se)
    wb = p1_ref[:, wb_off:wb_off + 9 * cb]       # (cb, 9*cb) 3x3 conv (BN scale folded)
    wc = p2_ref[:, 0:cb]                         # (cout, cb) final 1x1 conv (scale folded)
    bc = p2_ref[:, cb:cb + 1]                    # (cout, 1)

    # ---- stage A: 1x1 conv + bias + ReLU --------------------------------- (cb, L)
    x = x_ref[...]                                                   # (cin, L)
    y = jnp.dot(wa, x, preferred_element_type=jnp.float32)
    y = jnp.maximum(y + ba, 0.0)

    # ---- stage B: 3x3 SAME conv = 9 lane rolls (XLU) + ONE K=9*cb matmul - (cb, L)
    lane = jax.lax.broadcasted_iota(jnp.int32, (1, L), 1)
    col = _mod_c(lane, W)
    row = _mod_c(_div_c(lane, W), H)             # per-image row, valid across merged images
    row_ok = {-1: row >= 1, 0: None, 1: row < H - 1}
    col_ok = {-1: col >= 1, 0: None, 1: col < W - 1}
    k = 0
    for dy in (-1, 0, 1):
        for dx in (-1, 0, 1):
            s = dy * W + dx
            shifted = y if s == 0 else pltpu.roll(y, shift=(-s) % L, axis=1)
            rm, cm = row_ok[dy], col_ok[dx]
            mask = rm if cm is None else (cm if rm is None else jnp.logical_and(rm, cm))
            if mask is not None:
                shifted = jnp.where(mask, shifted, 0.0)
            patches_ref[k * cb:(k + 1) * cb, :] = shifted            # static, aligned slice
            k += 1
    y = jnp.dot(wb, patches_ref[...], preferred_element_type=jnp.float32)
    y = jnp.maximum(y + bb, 0.0)

    # ---- stage C: SqueezeExcitation, segmented per image ------------------ (cb, L)
    inv_area = 1.0 / M
    if ipb == 1:
        pooled = jnp.sum(y, axis=1, keepdims=True) * inv_area                        # (cb,1)
        h = jnp.maximum(jnp.sum(wse1 * pooled, axis=0, keepdims=True) + bse1, 0.0)   # (1,se)
        gate = jax.nn.sigmoid(jnp.sum(wse2t * h, axis=1, keepdims=True) + bse2)      # (cb,1)
        y = y * gate
    else:
        seg = _div_c(lane, M)                                                        # (1, L)
        gate = jnp.zeros_like(y)
        for i in range(ipb):                                                         # static
            m = seg == i
            pooled = jnp.sum(jnp.where(m, y, 0.0), axis=1, keepdims=True) * inv_area
            h = jnp.maximum(jnp.sum(wse1 * pooled, axis=0, keepdims=True) + bse1, 0.0)
            gi = jax.nn.sigmoid(jnp.sum(wse2t * h, axis=1, keepdims=True) + bse2)
            gate = jnp.where(m, gi, gate)
        y = y * gate

    # ---- stage D: final 1x1 conv + bias (no nonlinearity) ----------------- (cout, L)
    out = jnp.dot(wc, y, preferred_element_type=jnp.float32) + bc
    o_ref[...] = out.astype(o_ref.dtype)                             # lane-dense store


# ----------------------------------------------------------------------------
# BottleneckTransform forward (NCHW in / NCHW out, like the PyTorch module).
# ----------------------------------------------------------------------------
def bottleneck_transform(x_nchw, p, *, num_strips=None):
    N, cin, H, W = x_nchw.shape
    M = H * W
    cb = p["w_a"].shape[1]
    cout = p["w_c"].shape[1]
    se = p["w_se1"].shape[1]

    if num_strips is None:
        num_strips = _default_num_strips(N)
    ipb = N // num_strips
    L = ipb * M

    # ---- fold eval-mode BN scales into the conv weights (exact), channels-first ----
    wa = jnp.transpose(p["w_a"]) * p["s_a"].reshape(cb, 1)                   # (cb, cin)
    wb = (jnp.transpose(p["w_b"], (3, 0, 1, 2)).reshape(cb, 9 * cb)
          * p["s_b"].reshape(cb, 1))                                         # (cb, 9*cb)
    wc = jnp.transpose(p["w_c"]) * p["s_c"].reshape(cout, 1)                 # (cout, cb)
    ba = p["b_a"].reshape(cb, 1)
    bb = p["b_b"].reshape(cb, 1)
    bc = p["b_c"].reshape(cout, 1)
    wse1 = p["w_se1"]                                                        # (cb, se)
    wse2t = jnp.transpose(p["w_se2"])                                        # (cb, se)
    bse1b = jnp.broadcast_to(p["b_se1"].reshape(1, se), (cb, se))
    bse2 = p["b_se2"].reshape(cb, 1)

    # ---- pack everything into TWO slabs (2 tiny DMAs instead of 13) ----
    misc = jnp.concatenate([wa, wse1, wse2t, ba, bb, bse2, bse1b], axis=1)   # (cb, cin+3se+3)
    misc_w = misc.shape[1]
    wb_off = -(-misc_w // 128) * 128                 # lane-group aligned start for wb
    p1 = jnp.concatenate(
        [misc, jnp.zeros((cb, wb_off - misc_w), jnp.float32), wb], axis=1)   # (cb, wb_off+9cb)
    p2 = jnp.concatenate([wc, bc], axis=1)                                   # (cout, cb+1)

    # ---- per-strip, channels-first, flattened-spatial input layout ----
    # (metadata-only when ipb == 1; an 8 KiB transpose when the batch is merged)
    x2 = (x_nchw.reshape(num_strips, ipb, cin, M)
          .transpose(0, 2, 1, 3)
          .reshape(num_strips, cin, L))

    flops = N * 2 * M * (cin * cb + 9 * cb * cb + cb * cout) + N * 10 * M * cb
    bytes_accessed = 4 * (int(x2.size) + num_strips * cout * L
                          + int(p1.size) + int(p2.size))

    kern = functools.partial(_bottleneck_kernel, H=H, W=W, ipb=ipb, cin=cin,
                             cb=cb, se=se, cout=cout, wb_off=wb_off)
    out = pl.pallas_call(
        kern,
        out_shape=jax.ShapeDtypeStruct((num_strips, cout, L), jnp.float32),
        grid_spec=pltpu.PrefetchScalarGridSpec(
            num_scalar_prefetch=0,
            grid=(num_strips,),
            in_specs=[pl.BlockSpec((None, cin, L), lambda s: (s, 0, 0)),
                      pl.BlockSpec(p1.shape, lambda s: (0, 0)),
                      pl.BlockSpec(p2.shape, lambda s: (0, 0))],
            out_specs=pl.BlockSpec((None, cout, L), lambda s: (s, 0, 0)),
            scratch_shapes=[pltpu.VMEM((9 * cb, L), jnp.float32)],
        ),
        compiler_params=pltpu.CompilerParams(dimension_semantics=("parallel",)),
        cost_estimate=pl.CostEstimate(flops=int(flops),
                                      transcendentals=int(N * cb),
                                      bytes_accessed=int(bytes_accessed)),
    )(x2, p1, p2)

    return (out.reshape(num_strips, cout, ipb, M)
            .transpose(0, 2, 1, 3)
            .reshape(N, cout, H, W))


# ----------------------------------------------------------------------------
# Pure-JAX reference (same semantics).  BN scales are folded into the weights
# exactly as the kernel wrapper does, so both sides present identical matmul
# operands (TPU default matmul precision may be bf16); otherwise the code path
# (NHWC layout, lax.conv, plain matmuls for SE) is completely different.
# ----------------------------------------------------------------------------
def bottleneck_transform_ref(x_nchw, p):
    x = jnp.transpose(x_nchw, (0, 2, 3, 1))
    w_a = p["w_a"] * p["s_a"]                                  # (cin, cb)
    w_b = p["w_b"] * p["s_b"].reshape(1, 1, 1, -1)             # HWIO, scale output channel
    w_c = p["w_c"] * p["s_c"]                                  # (cb, cout)

    y = jnp.maximum(jnp.einsum("nhwc,cd->nhwd", x, w_a) + p["b_a"], 0.0)
    y = jax.lax.conv_general_dilated(
        y, w_b, (1, 1), "SAME", dimension_numbers=("NHWC", "HWIO", "NHWC"))
    y = jnp.maximum(y + p["b_b"], 0.0)
    pooled = jnp.mean(y, axis=(1, 2))                          # (N, cb)
    h = jnp.maximum(pooled @ p["w_se1"] + p["b_se1"], 0.0)
    g = jax.nn.sigmoid(h @ p["w_se2"] + p["b_se2"])
    y = y * g[:, None, None, :]
    y = jnp.einsum("nhwc,cd->nhwd", y, w_c) + p["b_c"]
    return jnp.transpose(y, (0, 3, 1, 2))


if __name__ == "__main__":
    # Small shapes consistent with the module:
    N, C_IN, H, W = 2, 4, 16, 16
    C_OUT = 8
    BOTTLENECK_MULTIPLE = 2
    C_B = int(round(C_OUT * BOTTLENECK_MULTIPLE))            # bottleneck_channels = 16
    SE_RATIO = 0.5
    C_SE = int(round(C_IN * SE_RATIO))                       # se_channels = 2

    key = jax.random.PRNGKey(0)
    ks = jax.random.split(key, 16)

    def nrm(k, shape, scale=0.2):
        return (scale * jax.random.normal(k, shape)).astype(jnp.float32)

    params = {
        # 1x1 conv + folded BN + ReLU
        "w_a": nrm(ks[0], (C_IN, C_B)),
        "s_a": (1.0 + 0.1 * jax.random.normal(ks[1], (1, C_B))).astype(jnp.float32),
        "b_a": nrm(ks[2], (1, C_B), 0.1),
        # 3x3 conv + folded BN + ReLU  (HWIO)
        "w_b": nrm(ks[3], (3, 3, C_B, C_B)),
        "s_b": (1.0 + 0.1 * jax.random.normal(ks[4], (1, C_B))).astype(jnp.float32),
        "b_b": nrm(ks[5], (1, C_B), 0.1),
        # SqueezeExcitation: 1x1 convs with bias
        "w_se1": nrm(ks[6], (C_B, C_SE)),
        "b_se1": nrm(ks[7], (1, C_SE), 0.1),
        "w_se2": nrm(ks[8], (C_SE, C_B)),
        "b_se2": nrm(ks[9], (1, C_B), 0.1),
        # final 1x1 conv + folded BN (no nonlinearity)
        "w_c": nrm(ks[10], (C_B, C_OUT)),
        "s_c": (1.0 + 0.1 * jax.random.normal(ks[11], (1, C_OUT))).astype(jnp.float32),
        "b_c": nrm(ks[12], (1, C_OUT), 0.1),
    }

    x = jax.random.normal(ks[15], (N, C_IN, H, W), dtype=jnp.float32)

    out = jax.block_until_ready(bottleneck_transform(x, params))
    ref = jax.block_until_ready(bottleneck_transform_ref(x, params))

    assert out.shape == (N, C_OUT, H, W), out.shape
    assert jnp.allclose(out, ref, rtol=1e-3, atol=1e-3), float(jnp.max(jnp.abs(out - ref)))
    print("KERNEL_OK")
</pallas_src>

<mosaic_0001>
module attributes {stable_mosaic.version = 11 : i64} {
  func.func @_bottleneck_kernel(%arg0: i32, %arg1: memref<1x4x256xf32, #tpu.memory_space<vmem>>, %arg2: memref<16x272xf32, #tpu.memory_space<vmem>>, %arg3: memref<8x17xf32, #tpu.memory_space<vmem>>, %arg4: memref<1x8x256xf32, #tpu.memory_space<vmem>>, %arg5: memref<144x256xf32, #tpu.memory_space<vmem>>) attributes {dimension_semantics = [#tpu.dimension_semantics<parallel>], iteration_bounds = array<i64: 2>, scalar_prefetch = 0 : i64, scratch_operands = 1 : i64, tpu.core_type = #tpu.core_type<tc>, window_params = [{transform_indices = @transform_0, window_bounds = array<i64: 1, 4, 256>}, {pipeline_mode = #tpu.pipeline_mode<synchronous>, transform_indices = @transform_1, window_bounds = array<i64: 16, 272>}, {pipeline_mode = #tpu.pipeline_mode<synchronous>, transform_indices = @transform_2, window_bounds = array<i64: 8, 17>}, {transform_indices = @transform_3, window_bounds = array<i64: 1, 8, 256>}]} {
    %c0 = arith.constant 0 : index
    %c0_0 = arith.constant 0 : index
    %0 = vector.load %arg2[%c0, %c0_0] : memref<16x272xf32, #tpu.memory_space<vmem>>, vector<16x4xf32>
    %c0_1 = arith.constant 0 : index
    %c4 = arith.constant 4 : index
    %1 = vector.load %arg2[%c0_1, %c4] : memref<16x272xf32, #tpu.memory_space<vmem>>, vector<16x2xf32>
    %c0_2 = arith.constant 0 : index
    %c6 = arith.constant 6 : index
    %2 = vector.load %arg2[%c0_2, %c6] : memref<16x272xf32, #tpu.memory_space<vmem>>, vector<16x2xf32>
    %c0_3 = arith.constant 0 : index
    %c8 = arith.constant 8 : index
    %3 = vector.load %arg2[%c0_3, %c8] : memref<16x272xf32, #tpu.memory_space<vmem>>, vector<16x1xf32>
    %c0_4 = arith.constant 0 : index
    %c9 = arith.constant 9 : index
    %4 = vector.load %arg2[%c0_4, %c9] : memref<16x272xf32, #tpu.memory_space<vmem>>, vector<16x1xf32>
    %c0_5 = arith.constant 0 : index
    %c10 = arith.constant 10 : index
    %5 = vector.load %arg2[%c0_5, %c10] : memref<16x272xf32, #tpu.memory_space<vmem>>, vector<16x1xf32>
    %c0_6 = arith.constant 0 : index
    %c11 = arith.constant 11 : index
    %6 = vector.load %arg2[%c0_6, %c11] : memref<16x272xf32, #tpu.memory_space<vmem>>, vector<1x2xf32>
    %c0_7 = arith.constant 0 : index
    %c128 = arith.constant 128 : index
    %7 = vector.load %arg2[%c0_7, %c128] : memref<16x272xf32, #tpu.memory_space<vmem>>, vector<16x144xf32>
    %c0_8 = arith.constant 0 : index
    %c0_9 = arith.constant 0 : index
    %8 = vector.load %arg3[%c0_8, %c0_9] : memref<8x17xf32, #tpu.memory_space<vmem>>, vector<8x16xf32>
    %c0_10 = arith.constant 0 : index
    %c16 = arith.constant 16 : index
    %9 = vector.load %arg3[%c0_10, %c16] : memref<8x17xf32, #tpu.memory_space<vmem>>, vector<8x1xf32>
    %c0_11 = arith.constant 0 : index
    %c0_12 = arith.constant 0 : index
    %c0_13 = arith.constant 0 : index
    %10 = vector.load %arg1[%c0_11, %c0_12, %c0_13] : memref<1x4x256xf32, #tpu.memory_space<vmem>>, vector<1x4x256xf32>
    %11 = vector.shape_cast %10 : vector<1x4x256xf32> to vector<4x256xf32>
    %cst = arith.constant dense<0.000000e+00> : vector<16x256xf32>
    %12 = tpu.matmul %0, %11, %cst {dimension_numbers = #tpu.dot_dimension_numbers<[1], [0], [0], [1], [0, 0, 1, 1], [], []>} : vector<16x4xf32>, vector<4x256xf32>, vector<16x256xf32> -> vector<16x256xf32>
    %13 = vector.broadcast %3 : vector<16x1xf32> to vector<16x256xf32>
    %14 = arith.addf %12, %13 : vector<16x256xf32>
    %cst_14 = arith.constant 0.000000e+00 : f32
    %15 = vector.broadcast %cst_14 : f32 to vector<16x256xf32>
    %16 = arith.maximumf %14, %15 : vector<16x256xf32>
    %17 = tpu.iota {dimensions = array<i32: 1>} : vector<1x256xi32>
    %c15_i32 = arith.constant 15 : i32
    %18 = vector.broadcast %c15_i32 : i32 to vector<1x256xi32>
    %19 = arith.andi %17, %18 : vector<1x256xi32>
    %c4_i32 = arith.constant 4 : i32
    %20 = vector.broadcast %c4_i32 : i32 to vector<1x256xi32>
    %21 = arith.shrsi %17, %20 : vector<1x256xi32>
    %c15_i32_15 = arith.constant 15 : i32
    %22 = vector.broadcast %c15_i32_15 : i32 to vector<1x256xi32>
    %23 = arith.andi %21, %22 : vector<1x256xi32>
    %c1_i32 = arith.constant 1 : i32
    %24 = vector.broadcast %c1_i32 : i32 to vector<1x256xi32>
    %25 = arith.cmpi sge, %23, %24 : vector<1x256xi32>
    %c15_i32_16 = arith.constant 15 : i32
    %26 = vector.broadcast %c15_i32_16 : i32 to vector<1x256xi32>
    %27 = arith.cmpi slt, %23, %26 : vector<1x256xi32>
    %c1_i32_17 = arith.constant 1 : i32
    %28 = vector.broadcast %c1_i32_17 : i32 to vector<1x256xi32>
    %29 = arith.cmpi sge, %19, %28 : vector<1x256xi32>
    %c15_i32_18 = arith.constant 15 : i32
    %30 = vector.broadcast %c15_i32_18 : i32 to vector<1x256xi32>
    %31 = arith.cmpi slt, %19, %30 : vector<1x256xi32>
    %c17_i32 = arith.constant 17 : i32
    %32 = tpu.dynamic_rotate %16 by %c17_i32 dim 1 : vector<16x256xf32>, i32 -> vector<16x256xf32>
    %33 = arith.andi %25, %29 : vector<1x256xi1>
    %cst_19 = arith.constant 0.000000e+00 : f32
    %34 = vector.shape_cast %33 : vector<1x256xi1> to vector<1x256xi1>
    %35 = vector.broadcast %34 : vector<1x256xi1> to vector<16x256xi1>
    %36 = vector.broadcast %cst_19 : f32 to vector<16x256xf32>
    %37 = arith.select %35, %32, %36 : vector<16x256xi1>, vector<16x256xf32>
    %c0_20 = arith.constant 0 : index
    %c0_21 = arith.constant 0 : index
    %38 = vector.load %arg5[%c0_20, %c0_21] : memref<144x256xf32, #tpu.memory_space<vmem>>, vector<16x256xf32>
    tpu.vector_store %arg5[%c0_20, %c0_21], %37 {strides = array<i32>} : memref<144x256xf32, #tpu.memory_space<vmem>>, vector<16x256xf32>,
    %c16_i32 = arith.constant 16 : i32
    %39 = tpu.dynamic_rotate %16 by %c16_i32 dim 1 : vector<16x256xf32>, i32 -> vector<16x256xf32>
    %cst_22 = arith.constant 0.000000e+00 : f32
    %40 = vector.shape_cast %25 : vector<1x256xi1> to vector<1x256xi1>
    %41 = vector.broadcast %40 : vector<1x256xi1> to vector<16x256xi1>
    %42 = vector.broadcast %cst_22 : f32 to vector<16x256xf32>
    %43 = arith.select %41, %39, %42 : vector<16x256xi1>, vector<16x256xf32>
    %c16_23 = arith.constant 16 : index
    %c0_24 = arith.constant 0 : index
    %44 = vector.load %arg5[%c16_23, %c0_24] : memref<144x256xf32, #tpu.memory_space<vmem>>, vector<16x256xf32>
    tpu.vector_store %arg5[%c16_23, %c0_24], %43 {strides = array<i32>} : memref<144x256xf32, #tpu.memory_space<vmem>>, vector<16x256xf32>,
    %c15_i32_25 = arith.constant 15 : i32
    %45 = tpu.dynamic_rotate %16 by %c15_i32_25 dim 1 : vector<16x256xf32>, i32 -> vector<16x256xf32>
    %46 = arith.andi %25, %31 : vector<1x256xi1>
    %cst_26 = arith.constant 0.000000e+00 : f32
    %47 = vector.shape_cast %46 : vector<1x256xi1> to vector<1x256xi1>
    %48 = vector.broadcast %47 : vector<1x256xi1> to vector<16x256xi1>
    %49 = vector.broadcast %cst_26 : f32 to vector<16x256xf32>
    %50 = arith.select %48, %45, %49 : vector<16x256xi1>, vector<16x256xf32>
    %c32 = arith.constant 32 : index
    %c0_27 = arith.constant 0 : index
    %51 = vector.load %arg5[%c32, %c0_27] : memref<144x256xf32, #tpu.memory_space<vmem>>, vector<16x256xf32>
    tpu.vector_store %arg5[%c32, %c0_27], %50 {strides = array<i32>} : memref<144x256xf32, #tpu.memory_space<vmem>>, vector<16x256xf32>,
    %c1_i32_28 = arith.constant 1 : i32
    %52 = tpu.dynamic_rotate %16 by %c1_i32_28 dim 1 : vector<16x256xf32>, i32 -> vector<16x256xf32>
    %cst_29 = arith.constant 0.000000e+00 : f32
    %53 = vector.shape_cast %29 : vector<1x256xi1> to vector<1x256xi1>
    %54 = vector.broadcast %53 : vector<1x256xi1> to vector<16x256xi1>
    %55 = vector.broadcast %cst_29 : f32 to vector<16x256xf32>
    %56 = arith.select %54, %52, %55 : vector<16x256xi1>, vector<16x256xf32>
    %c48 = arith.constant 48 : index
    %c0_30 = arith.constant 0 : index
    %57 = vector.load %arg5[%c48, %c0_30] : memref<144x256xf32, #tpu.memory_space<vmem>>, vector<16x256xf32>
    tpu.vector_store %arg5[%c48, %c0_30], %56 {strides = array<i32>} : memref<144x256xf32, #tpu.memory_space<vmem>>, vector<16x256xf32>,
    %c64 = arith.constant 64 : index
    %c0_31 = arith.constant 0 : index
    %58 = vector.load %arg5[%c64, %c0_31] : memref<144x256xf32, #tpu.memory_space<vmem>>, vector<16x256xf32>
    tpu.vector_store %arg5[%c64, %c0_31], %16 {strides = array<i32>} : memref<144x256xf32, #tpu.memory_space<vmem>>, vector<16x256xf32>,
    %c255_i32 = arith.constant 255 : i32
    %59 = tpu.dynamic_rotate %16 by %c255_i32 dim 1 : vector<16x256xf32>, i32 -> vector<16x256xf32>
    %cst_32 = arith.constant 0.000000e+00 : f32
    %60 = vector.shape_cast %31 : vector<1x256xi1> to vector<1x256xi1>
    %61 = vector.broadcast %60 : vector<1x256xi1> to vector<16x256xi1>
    %62 = vector.broadcast %cst_32 : f32 to vector<16x256xf32>
    %63 = arith.select %61, %59, %62 : vector<16x256xi1>, vector<16x256xf32>
    %c80 = arith.constant 80 : index
    %c0_33 = arith.constant 0 : index
    %64 = vector.load %arg5[%c80, %c0_33] : memref<144x256xf32, #tpu.memory_space<vmem>>, vector<16x256xf32>
    tpu.vector_store %arg5[%c80, %c0_33], %63 {strides = array<i32>} : memref<144x256xf32, #tpu.memory_space<vmem>>, vector<16x256xf32>,
    %c241_i32 = arith.constant 241 : i32
    %65 = tpu.dynamic_rotate %16 by %c241_i32 dim 1 : vector<16x256xf32>, i32 -> vector<16x256xf32>
    %66 = arith.andi %27, %29 : vector<1x256xi1>
    %cst_34 = arith.constant 0.000000e+00 : f32
    %67 = vector.shape_cast %66 : vector<1x256xi1> to vector<1x256xi1>
    %68 = vector.broadcast %67 : vector<1x256xi1> to vector<16x256xi1>
    %69 = vector.broadcast %cst_34 : f32 to vector<16x256xf32>
    %70 = arith.select %68, %65, %69 : vector<16x256xi1>, vector<16x256xf32>
    %c96 = arith.constant 96 : index
    %c0_35 = arith.constant 0 : index
    %71 = vector.load %arg5[%c96, %c0_35] : memref<144x256xf32, #tpu.memory_space<vmem>>, vector<16x256xf32>
    tpu.vector_store %arg5[%c96, %c0_35], %70 {strides = array<i32>} : memref<144x256xf32, #tpu.memory_space<vmem>>, vector<16x256xf32>,
    %c240_i32 = arith.constant 240 : i32
    %72 = tpu.dynamic_rotate %16 by %c240_i32 dim 1 : vector<16x256xf32>, i32 -> vector<16x256xf32>
    %cst_36 = arith.constant 0.000000e+00 : f32
    %73 = vector.shape_cast %27 : vector<1x256xi1> to vector<1x256xi1>
    %74 = vector.broadcast %73 : vector<1x256xi1> to vector<16x256xi1>
    %75 = vector.broadcast %cst_36 : f32 to vector<16x256xf32>
    %76 = arith.select %74, %72, %75 : vector<16x256xi1>, vector<16x256xf32>
    %c112 = arith.constant 112 : index
    %c0_37 = arith.constant 0 : index
    %77 = vector.load %arg5[%c112, %c0_37] : memref<144x256xf32, #tpu.memory_space<vmem>>, vector<16x256xf32>
    tpu.vector_store %arg5[%c112, %c0_37], %76 {strides = array<i32>} : memref<144x256xf32, #tpu.memory_space<vmem>>, vector<16x256xf32>,
    %c239_i32 = arith.constant 239 : i32
    %78 = tpu.dynamic_rotate %16 by %c239_i32 dim 1 : vector<16x256xf32>, i32 -> vector<16x256xf32>
    %79 = arith.andi %27, %31 : vector<1x256xi1>
    %cst_38 = arith.constant 0.000000e+00 : f32
    %80 = vector.shape_cast %79 : vector<1x256xi1> to vector<1x256xi1>
    %81 = vector.broadcast %80 : vector<1x256xi1> to vector<16x256xi1>
    %82 = vector.broadcast %cst_38 : f32 to vector<16x256xf32>
    %83 = arith.select %81, %78, %82 : vector<16x256xi1>, vector<16x256xf32>
    %c128_39 = arith.constant 128 : index
    %c0_40 = arith.constant 0 : index
    %84 = vector.load %arg5[%c128_39, %c0_40] : memref<144x256xf32, #tpu.memory_space<vmem>>, vector<16x256xf32>
    tpu.vector_store %arg5[%c128_39, %c0_40], %83 {strides = array<i32>} : memref<144x256xf32, #tpu.memory_space<vmem>>, vector<16x256xf32>,
    %c0_41 = arith.constant 0 : index
    %c0_42 = arith.constant 0 : index
    %85 = vector.load %arg5[%c0_41, %c0_42] : memref<144x256xf32, #tpu.memory_space<vmem>>, vector<144x256xf32>
    %cst_43 = arith.constant dense<0.000000e+00> : vector<16x256xf32>
    %86 = tpu.matmul %7, %85, %cst_43 {dimension_numbers = #tpu.dot_dimension_numbers<[1], [0], [0], [1], [0, 0, 1, 1], [], []>} : vector<16x144xf32>, vector<144x256xf32>, vector<16x256xf32> -> vector<16x256xf32>
    %87 = vector.broadcast %4 : vector<16x1xf32> to vector<16x256xf32>
    %88 = arith.addf %86, %87 : vector<16x256xf32>
    %cst_44 = arith.constant 0.000000e+00 : f32
    %89 = vector.broadcast %cst_44 : f32 to vector<16x256xf32>
    %90 = arith.maximumf %88, %89 : vector<16x256xf32>
    %cst_45 = arith.constant dense<0.000000e+00> : vector<16xf32>
    %91 = vector.multi_reduction <add>, %90, %cst_45 [1] : vector<16x256xf32> to vector<16xf32>
    %92 = vector.shape_cast %91 : vector<16xf32> to vector<16x1xf32>
    %cst_46 = arith.constant 3.906250e-03 : f32
    %93 = vector.broadcast %cst_46 : f32 to vector<16x1xf32>
    %94 = arith.mulf %92, %93 : vector<16x1xf32>
    %95 = vector.broadcast %94 : vector<16x1xf32> to vector<16x2xf32>
    %96 = arith.mulf %1, %95 : vector<16x2xf32>
    %cst_47 = arith.constant dense<0.000000e+00> : vector<2xf32>
    %97 = vector.multi_reduction <add>, %96, %cst_47 [0] : vector<16x2xf32> to vector<2xf32>
    %98 = vector.shape_cast %97 : vector<2xf32> to vector<1x2xf32>
    %99 = arith.addf %98, %6 : vector<1x2xf32>
    %cst_48 = arith.constant 0.000000e+00 : f32
    %100 = vector.broadcast %cst_48 : f32 to vector<1x2xf32>
    %101 = arith.maximumf %99, %100 : vector<1x2xf32>
    %102 = vector.broadcast %101 : vector<1x2xf32> to vector<16x2xf32>
    %103 = arith.mulf %2, %102 : vector<16x2xf32>
    %cst_49 = arith.constant dense<0.000000e+00> : vector<16xf32>
    %104 = vector.multi_reduction <add>, %103, %cst_49 [1] : vector<16x2xf32> to vector<16xf32>
    %105 = vector.shape_cast %104 : vector<16xf32> to vector<16x1xf32>
    %106 = arith.addf %105, %5 : vector<16x1xf32>
    %107 = arith.negf %106 : vector<16x1xf32>
    %108 = math.exp %107 : vector<16x1xf32>
    %cst_50 = arith.constant 1.000000e+00 : f32
    %109 = vector.broadcast %cst_50 : f32 to vector<16x1xf32>
    %110 = arith.addf %109, %108 : vector<16x1xf32>
    %111 = arith.divf %109, %110 : vector<16x1xf32>
    %112 = vector.broadcast %111 : vector<16x1xf32> to vector<16x256xf32>
    %113 = arith.mulf %90, %112 : vector<16x256xf32>
    %cst_51 = arith.constant dense<0.000000e+00> : vector<8x256xf32>
    %114 = tpu.matmul %8, %113, %cst_51 {dimension_numbers = #tpu.dot_dimension_numbers<[1], [0], [0], [1], [0, 0, 1, 1], [], []>} : vector<8x16xf32>, vector<16x256xf32>, vector<8x256xf32> -> vector<8x256xf32>
    %115 = vector.broadcast %9 : vector<8x1xf32> to vector<8x256xf32>
    %116 = arith.addf %114, %115 : vector<8x256xf32>
    %c0_52 = arith.constant 0 : index
    %c0_53 = arith.constant 0 : index
    %c0_54 = arith.constant 0 : index
    %117 = vector.load %arg4[%c0_52, %c0_53, %c0_54] : memref<1x8x256xf32, #tpu.memory_space<vmem>>, vector<1x8x256xf32>
    %118 = vector.shape_cast %117 : vector<1x8x256xf32> to vector<8x256xf32>
    %119 = vector.shape_cast %116 : vector<8x256xf32> to vector<1x8x256xf32>
    tpu.vector_store %arg4[%c0_52, %c0_53, %c0_54], %119 {strides = array<i32>} : memref<1x8x256xf32, #tpu.memory_space<vmem>>, vector<1x8x256xf32>,
    return
  }
  func.func @transform_0(%arg0: i32) -> (i32, i32, i32) {
    %c0_i32 = arith.constant 0 : i32
    %c0_i32_0 = arith.constant 0 : i32
    %c0_i32_1 = arith.constant 0 : i32
    return %arg0, %c0_i32, %c0_i32_0 : i32, i32, i32
  }
  func.func @transform_1(%arg0: i32) -> (i32, i32) {
    %c0_i32 = arith.constant 0 : i32
    %c0_i32_0 = arith.constant 0 : i32
    %c0_i32_1 = arith.constant 0 : i32
    return %c0_i32, %c0_i32_0 : i32, i32
  }
  func.func @transform_2(%arg0: i32) -> (i32, i32) {
    %c0_i32 = arith.constant 0 : i32
    %c0_i32_0 = arith.constant 0 : i32
    %c0_i32_1 = arith.constant 0 : i32
    return %c0_i32, %c0_i32_0 : i32, i32
  }
  func.func @transform_3(%arg0: i32) -> (i32, i32, i32) {
    %c0_i32 = arith.constant 0 : i32
    %c0_i32_0 = arith.constant 0 : i32
    %c0_i32_1 = arith.constant 0 : i32
    return %arg0, %c0_i32, %c0_i32_0 : i32, i32, i32
  }
}

</mosaic_0001>

<bundles_post_ra>
// kernel: tpu_custom_call.1
= control target key start
LH: loop header
LB: loop body
LE: loop exit
PB: predicated region body
PF: predicated region fallthrough
CT: control target
= control target key end

     0   :  { %8 = vsyncpa [#allocation4], 0  ;;  %s1948_s0 = inlined_call_operand.hbm [shape: f32[2,4,256], index: 0, kind: input, shape index: {}]   ;;  %s1949_s1 = inlined_call_operand.hbm [shape: f32[16,272], index: 1, kind: input, shape index: {}]   ;;  %s1950_s2 = inlined_call_operand.hbm [shape: f32[8,17], index: 2, kind: input, shape index: {}]   ;;  %s1951_s3 = inlined_call_operand.hbm [shape: f32[2,8,256], index: 3, kind: output, shape index: {}]  }
   0x1   :  { %10 = vsyncpa [#allocation4 + $0x1], 0 }
   0x2   :  { %11 = vsyncpa [#allocation7], 0 }
   0x3   :  { %12 = vsyncpa [#allocation5], 0 }
   0x4   :  { %14 = vsyncpa [#allocation5 + $0x1], 0  ;;  %s1448_s12 = smov 0   ;;  %s1450_s13 = smov 0  }
   0x5   :  { %s1452_s14 = smov 0   ;;  %s1454_s15 = smov 0  }
   0x6 LB: > { %s1469_s16 = sadd.s32 4294967295, %s1404_s15   ;;  %s950_s17 = sadd.s32 4294967294, %s1404_s15   ;;  %s1404_s15 = sphi %s1454_s15, %s1999_s15   ;;  %s1400_s14 = sphi %s1452_s14, %s1998_s14   ;;  %s1396_s13 = sphi %s1450_s13, %s1997_s13   ;;  %s1392_s12 = sphi %s1448_s12, %s1996_s12  }
   0x7   : > { %p40_p0 = scmp.ne.s32.totalorder %s1396_s13, %s1392_s12  ;;  %p1952_p1 = scmp.eq.s32.totalorder %s1469_s16, 0 }
   0x8   : > { %p112_p3 = scmp.eq.s32.totalorder %s950_s17, 1  ;;  %p951_p5 = scmp.ge.s32.totalorder %s1404_s15, 1 }
   0x9   : > { %p1478_p4 = por %p1952_p1, %p40_p0  ;;  %p119_p7 = scmp.lt.s32.totalorder %s1404_s15, 3 }
   0xa   : > { %p1483_p6 = por %p112_p3, %p40_p0  ;;  %s1406_s21 = smov [#allocation6]  }
   0xb   : > { %s1955_s18 = scalar_select %p1478_p4, 1, 0 }
   0xc   : > { %s1956_s19 = scalar_select %p1483_p6, 1, 0 }
   0xd   : > { %p1488_p8 = pnand %p951_p5, %p119_p7  ;;  %s131_s22 = sshll.u32 %s1406_s21, 4  ;;  %s1492_s22 = int_to_ptr.vmem [resolvable:$true] %s131_s22 }
   0xe   : > { %s1407_s24 = smov [#allocation8]   ;;  %s1248_s28 = scalar_lea.hbm %s1949_s1, 768 }
   0xf   : > { %p1079_p9 = pneg %p1488_p8  ;;  %s145_s25 = sshll.u32 %s1407_s24, 4  ;;  %s1503_s25 = int_to_ptr.vmem [resolvable:$true] %s145_s25 }
  0x10   : > { %p1249_p12 = scmp.ne.s32.totalorder %s1949_s1, %s1248_s28  ;;  %p1255_p5 = scmp.lt.u32.totalorder %s1248_s28, %s1949_s1 }
  0x11   : > { %p1499_p11 = pnand %p1079_p9, %p1952_p1 }
  0x13   : > { %p1250_p13 = pneg %p1499_p11 }
  0x15   : > { %p1251_p0 = pnand %p1250_p13, %p1249_p12 }
  0x17   : > { %p1252_p3 = pneg %p1251_p0 }
  0x19   : > { %p1257_p7 = pnand %p1255_p5, %p1252_p3 }
  0x1b   : > { %1260 = shalt.err (!%p1257_p7)
}
  0x1c   : > { %s1261_s6 = scalar_lea.vmem %s1492_s22, 768  ;;  %p1269_p2 = scmp.lt.s32.totalorder %s1492_s22, %s1492_s22 }
  0x1d   : > { %p1262_p9 = scmp.ne.s32.totalorder %s1492_s22, %s1261_s6  ;;  %p1270_p12 = scmp.lt.s32.totalorder %s1261_s6, %s1261_s6 }
  0x1f   : > { %p1264_p10 = pnand %p1262_p9, %p1250_p13  ;;  %p1271_p0 = por %p1270_p12, %p1269_p2 }
  0x21   : > { %p1265_p1 = pneg %p1264_p10 }
  0x23   : > { %p1272_p6 = pnand %p1271_p0, %p1265_p1 }
  0x25   : > { %1275 = shalt.err (!%p1272_p6)
}
  0x26   : > { %s1408_s7 = smov 384   ;;  %s1409_s8 = smov 24  }
  0x27   : > { %1082 = dma.hbm_to_vmem [thread:$0]  (!%p1499_p11), %s1949_s1, 768, %s1492_s22, [#allocation7], %s1408_s7, %s1408_s7, %s1409_s8  }
  0x28   : > { %s1276_s21 = scalar_lea.hbm %s1950_s2, 128 }
  0x29   : > { %p1277_p2 = scmp.ne.s32.totalorder %s1950_s2, %s1276_s21  ;;  %p1283_p10 = scmp.lt.u32.totalorder %s1276_s21, %s1950_s2 }
  0x2b   : > { %p1279_p1 = pnand %p1277_p2, %p1250_p13 }
  0x2d   : > { %p1280_p6 = pneg %p1279_p1 }
  0x2f   : > { %p1285_p3 = pnand %p1283_p10, %p1280_p6 }
  0x31   : > { %1288 = shalt.err (!%p1285_p3)
}
  0x32   : > { %s1289_s22 = scalar_lea.vmem %s1503_s25, 128  ;;  %p1297_p12 = scmp.lt.s32.totalorder %s1503_s25, %s1503_s25 }
  0x33   : > { %p1290_p5 = scmp.ne.s32.totalorder %s1503_s25, %s1289_s22  ;;  %p1298_p0 = scmp.lt.s32.totalorder %s1289_s22, %s1289_s22 }
  0x35   : > { %p1292_p7 = pnand %p1290_p5, %p1250_p13  ;;  %p1299_p2 = por %p1298_p0, %p1297_p12 }
  0x37   : > { %p1293_p9 = pneg %p1292_p7 }
  0x39   : > { %p1300_p1 = pnand %p1299_p2, %p1293_p9 }
  0x3b   : > { %1303 = shalt.err (!%p1300_p1)
}
  0x3c   : > { %1085 = dma.hbm_to_vmem [thread:$0]  (!%p1499_p11), %s1950_s2, 128, %s1503_s25, [#allocation7]  }
  0x3d   : > { %s1558_s4 = sadd.s32 1, %s1404_s15   ;;  %s27_s23 = sadd.s32 1, %s1400_s14 }
  0x3e   : > { %s24_s5 = ssub.s32 %s1404_s15, %s1558_s4  ;;  %p34_p13 = scmp.ne.s32.totalorder %s1400_s14, %s1396_s13 }
  0x3f   : > { %p25_p6 = scmp.eq.s32.totalorder %s24_s5, 0  ;;  %p35_p10 = scmp.eq.s32.totalorder %s1404_s15, 0 }
  0x40   : > { %p1959_p3 = scmp.eq.s32.totalorder %s1469_s16, 1  ;;  %p1096_p7 = scmp.lt.s32.totalorder %s1404_s15, 2 }
  0x41   : > { %s1574_s7 = scalar_select %p25_p6, %s1400_s14, %s27_s23  }
  0x42   : > { %p1568_p5 = por %p1959_p3, %p34_p13  ;;  %p36_p9 = por %p35_p10, %p34_p13 }
  0x43   : > { %s156_s8 = sand.u32 1, %s1400_s14   ;;  %s977_s25 = sshll.u32 %s1404_s15, 7 }
  0x44   : > { %s1960_s6 = scalar_select %p1568_p5, 1, 0 }
  0x45   : > { %s955_s9 = sshll.u32 %s156_s8, 3  ;;  %s1581_s17 = scalar_lea.hbm %s1948_s0, %s977_s25 }
  0x46   : > { %s160_s21 = scalar_lea.vmem [#allocation3], %s955_s9  ;;  %p1585_p11 = pnand %p1096_p7, %p36_p9 }
  0x47   : > { %s168_s24 = sshll.u32 %s160_s21, 4  ;;  %s157_s27 = scalar_lea.sflag [#allocation4], %s156_s8  ;;  %s1583_s24 = int_to_ptr.vmem [resolvable:$true] %s168_s24 }
  0x48   : > { %s1304_s28 = scalar_lea.hbm %s1581_s17, 128  ;;  %p1306_p0 = pneg %p1585_p11 }
  0x49   : > { %p1305_p12 = scmp.ne.s32.totalorder %s1581_s17, %s1304_s28  ;;  %s1309_s30 = scalar_lea.hbm %s1948_s0, 256 }
  0x4a   : > { %p1310_p13 = scmp.lt.u32.totalorder %s1581_s17, %s1948_s0  ;;  %p1311_p6 = scmp.lt.u32.totalorder %s1309_s30, %s1304_s28 }
  0x4b   : > { %p1307_p2 = pnand %p1306_p0, %p1305_p12  ;;  %p1313_p3 = scmp.lt.u32.totalorder %s1304_s28, %s1581_s17 }
  0x4c   : > { %p1312_p10 = por %p1311_p6, %p1310_p13 }
  0x4d   : > { %p1308_p1 = pneg %p1307_p2 }
  0x4e   : > { %p1314_p7 = por %p1313_p3, %p1312_p10 }
  0x50   : > { %p1315_p9 = pnand %p1314_p7, %p1308_p1 }
  0x52   : > { %1318 = shalt.err (!%p1315_p9)
}
  0x53   : > { %s1319_s8 = scalar_lea.vmem %s1583_s24, 128  ;;  %s1410_s9 = smov [#allocation3]  }
  0x54   : > { %p1320_p12 = scmp.ne.s32.totalorder %s1583_s24, %s1319_s8  ;;  %s1324_s25 = sshll.u32 %s1410_s9, 4  ;;  %s1325_s25 = int_to_ptr.vmem [resolvable:$false] %s1324_s25 }
  0x55   : > { %s1326_s10 = scalar_lea.vmem %s1325_s25, 256  ;;  %p1327_p4 = scmp.lt.s32.totalorder %s1583_s24, %s1325_s25 }
  0x56   : > { %p1322_p2 = pnand %p1320_p12, %p1306_p0  ;;  %p1328_p13 = scmp.lt.s32.totalorder %s1326_s10, %s1319_s8 }
  0x58   : > { %p1323_p5 = pneg %p1322_p2  ;;  %p1329_p6 = por %p1328_p13, %p1327_p4 }
  0x5a   : > { %p1330_p10 = pnand %p1329_p6, %p1323_p5 }
  0x5c   : > { %1333 = shalt.err (!%p1330_p10)
}
  0x5d   : > { %1089 = dma.hbm_to_vmem [thread:$0]  (!%p1585_p11), %s1581_s17, 128, %s1583_s24, %s157_s27  }
  0x5e   : > { %177 = sbr.rel (%p1488_p8) target bundleno = 1651 (0x673), region = 32  ;;  %s1617_s11 = sand.u32 (!%p1488_p8), 1, %s1396_s13  }
  0x5f   : > { %s959_s21 = sshll.u32 (!%p1488_p8), %s1617_s11, 3  ;;  %s180_s28 = scalar_lea.sflag (!%p1488_p8), [#allocation4], %s1617_s11 }
  0x60   : > { %s183_s22 = scalar_lea.vmem (!%p1488_p8), [#allocation3], %s959_s21  ;;  %p1962_p4 = scmp.ne.s32.totalorder (!%p1488_p8), %s1955_s18, 0 }
  0x65   : > { %1379 = dma.done.wait (%p1962_p4), %s180_s28, 128  }
  0x66   : > { %1381 = vsyncadd (%p1962_p4), %s180_s28, 4294967168  ;;  %p1963_p5 = scmp.eq.s32.totalorder %s1469_s16, 0 }
  0x68   : > { %1383 = dma.done.wait (%p1963_p5), [#allocation7], 896   ;;  %p1964_p11 = pmov %p1963_p5 }
  0x69   : > { %v1411_v0 = vmov 0.0   ;;  %v1412_v1 = vmov 8   ;;  %v222_v2 = vld [vmem:[%s183_s22] sm:$0xff]  ;;  %vm240_vm0 = vcmask 1043456   ;;  %v1629_v3 = vld [vmem:[#allocation6] sm:$0xff]  ;;  %vm235_vm1 = vcmask 31744  }
  0x6a   : > { %1385 = vsyncadd (%p1964_p11), [#allocation7], 4294966400  ;;  %309 = vmatprep.mubr.f32.mxu0 %v1411_v0  ;;  %1152 = vset.pattern.permute.xlu0 %v1412_v1  ;;  %v234_v4 = vcombine.high %v222_v2, %v222_v2  ;;  %v1632_v5 = vld [vmem:[#allocation6 + $0x18] sm:$0xff]  ;;  %s1413_s18 = smov 16   ;;  %s1414_s20 = smov 17   ;;  %v218_v24 = vld [vmem:[#allocation6 + $0x10] sm:$0xff]  ;;  %v326_v26 = vlaneseq }
  0x6b   : > { %225 = vperm.xlu0 %1152, %v1629_v3   ;;  %s1415_s17 = smov 15   ;;  %s1416_s24 = smov 1   ;;  %vm599_vm2 = vcmask 130048   ;;  %v1421_v25 = vmov 9   ;;  %v219_v61 = vld [vmem:[#allocation6 + $0x20] sm:$0xff] }
  0x6c   : > { %963 = vmatprep.subr.msk.mxu0 %vm240_vm0, %v234_v4  ;;  %s1417_s26 = smov 127   ;;  %s1418_s27 = smov 113   ;;  %967 = vmatprep.mubr.msk.f32.mxu1 %vm599_vm2, %v218_v24  ;;  %v1645_v27 = vand.u32 127, %v326_v26 }
  0x6d   : > { %964 = vmatpush1.msk.msra.mxu0 %vm240_vm0, %v222_v2  ;;  %s1419_s29 = smov 112   ;;  %s1420_s30 = smov 111   ;;  %1234 = vset.pattern.permute.xlu1 %v1421_v25 }
  0x6e   : > { %965 = vmatmul.mubr.msk.f32.vlgmr.msra.gmra.mrb[0].mxu0 %vm235_vm1, %v1629_v3  ;;  %v328_v28 = vadd.s32 128, %v1645_v27  ;;  %v331_v30 = vshra.s32 %v1645_v27, 4  ;;  %v329_v33 = vand.u32 15, %v1645_v27  ;;  %vm351_vm7 = vcmp.lt.s32.totalorder %v1645_v27, 17  ;;  %s1422_s23 = smov 121   ;;  %s1423_s5 = smov 2  }
  0x6f   : > { %230 = vperm.xlu0 %1152, %v1632_v5   ;;  %315 = vmatprep.mubr.f32.mxu0 %v1411_v0  ;;  %vm378_vm11 = vcmp.lt.s32.totalorder %v1645_v27, 16  ;;  %s1424_s8 = smov 122   ;;  %s962_s9 = sshll.u32 %s1617_s11, 4 }
  0x70   : > { %v332_v29 = vshra.s32 %v328_v28, 4  ;;  %v330_v31 = vand.u32 15, %v328_v28  ;;  %v1652_v34 = vand.u32 15, %v331_v30  ;;  %vm1660_vm6 = vcmp.ge.s32.totalorder %v329_v33, 1  ;;  %s978_s25 = sshll.u32 %s1469_s16, 8  ;;  %s213_s10 = scalar_lea.vmem [#allocation9], %s962_s9 }
  0x71   : > { %vm1699_vm15 = vcmp.lt.s32.totalorder %v329_v33, 15  ;;  %s861_s21 = sshll.u32 %s213_s10, 4  ;;  %p1993_p0 = scmp.ne.s32.totalorder %s1960_s6, 0  ;;  %s1906_s21 = int_to_ptr.vmem [resolvable:$true] %s861_s21 }
  0x72   : > { %966 = vmatmul.mubr.msk.f32.gmra.mrb[2].mxu0 %vm235_vm1, %v1632_v5  ;;  %v1649_v32 = vand.u32 15, %v332_v29  ;;  %vm1655_vm4 = vcmp.ge.s32.totalorder %v330_v31, 1  ;;  %vm335_vm5 = vcmp.ge.s32.totalorder %v1652_v34, 1  ;;  %vm1688_vm13 = vcmp.lt.s32.totalorder %v330_v31, 15  ;;  %s1334_s16 = scalar_lea.vmem %s1906_s21, 256 }
  0x73   : > { %837 = vmatprep.mubr.f32.mxu0 %v1411_v0  ;;  %1233 = vset.pattern.permute.xlu0 %v1421_v25  ;;  %vm1677_vm9 = vmand %vm335_vm5, %vm1660_vm6  ;;  %vm403_vm1 = vcmp.lt.s32.totalorder %v1645_v27, 15  ;;  %p1335_p8 = scmp.ne.s32.totalorder %s1906_s21, %s1334_s16 }
  0x74   : > { %vm336_vm3 = vcmp.ge.s32.totalorder %v1649_v32, 1  ;;  %vm1015_vm12 = vmpackc.low %vm1677_vm9, %vm1677_vm9 }
  0x75   : > { %vm1669_vm8 = vmand %vm336_vm3, %vm1655_vm4  ;;  %p1336_p1 = pnand %p1335_p8, %p1993_p0 }
  0x76   : > { %vm1012_vm10 = vmpackc.low %vm1669_vm8, %vm1669_vm8 }
  0x77   : > { %vm1695_vm14 = vmpackc.low %vm336_vm3, %vm336_vm3  ;;  %p1337_p3 = pneg %p1336_p1 }
  0x78   : > { %vm1714_vm0 = vmpackc.low %vm335_vm5, %vm335_vm5 }
  0x79   : > { %vm1731_vm8 = vmand %vm335_vm5, %vm1699_vm15  ;;  %vm430_vm5 = vcmp.lt.s32.totalorder %v1645_v27, 1 }
  0x7a   : > { %vm1027_vm9 = vmpackc.low %vm1731_vm8, %vm1731_vm8  ;;  %vm337_vm8 = vcmp.lt.s32.totalorder %v1652_v34, 15 }
  0xea   : > { %v226_v6 = vpop.permute.xlu0 %225 }
  0xee   : > { %v231_v10 = vpop.permute.xlu0 %230 }
 0x141   : > { %v311_v7 = vpop.f32.mrb[0].mxu0 }
 0x142   : > { %v313_v8 = vpop.f32.mrb[1].mxu0  ;;  %v312_v9 = vadd.f32 %v311_v7, %v226_v6 }
 0x143   : > { %v314_v11 = vadd.f32 %v313_v8, %v226_v6 }
 0x144   : > { %v322_v16 = vmax.f32 %v312_v9, 0.0 }
 0x145   : > { %v317_v12 = vpop.f32.mrb[2].mxu0  ;;  %v323_v18 = vmax.f32 %v314_v11, 0.0 }
 0x146   : > { %v318_v13 = vadd.f32 %v317_v12, %v231_v10  ;;  %v319_v14 = vpop.f32.mrb[3].mxu0 }
 0x147   : > { %v320_v15 = vadd.f32 %v319_v14, %v231_v10 }
 0x148   : > { %v324_v17 = vmax.f32 %v318_v13, 0.0 }
 0x149   : > { %v325_v19 = vmax.f32 %v320_v15, 0.0 }
 0x14a   : > { %v1158_v20 = vpack.i.bf16 %v324_v17, %v322_v16  ;;  %v1639_v23 = vpack.c.bf16 %v324_v17, %v322_v16 }
 0x14b   : > { %v1173_v21 = vpack.i.bf16 %v325_v19, %v323_v18  ;;  %v1637_v22 = vpack.c.bf16 %v325_v19, %v323_v18 }
 0x14c   : > { %1159 = vrot.lane.b32.xlu0 %v1158_v20, %s1413_s18  ;;  %1154 = vrot.lane.b32.xlu1 %v1158_v20, %s1414_s20 }
 0x150   : > { %1164 = vrot.lane.b32.xlu0 %v1158_v20, %s1415_s17  ;;  %1174 = vrot.lane.b32.xlu1 %v1173_v21, %s1414_s20  ;;  %s847_s20 = scalar_lea.sflag [#allocation5], %s1617_s11 }
 0x154   : > { %1169 = vrot.lane.b32.xlu0 %v1158_v20, %s1416_s24  ;;  %1179 = vrot.lane.b32.xlu1 %v1173_v21, %s1413_s18  ;;  %s1904_s18 = scalar_lea.hbm %s1951_s3, %s978_s25 }
 0x158   : > { %1194 = vrot.lane.b32.xlu0 %v1158_v20, %s1417_s26  ;;  %1184 = vrot.lane.b32.xlu1 %v1173_v21, %s1415_s17  ;;  %s1427_s17 = smov [#allocation9]  }
 0x15c   : > { %1199 = vrot.lane.b32.xlu0 %v1158_v20, %s1418_s27  ;;  %1189 = vrot.lane.b32.xlu1 %v1173_v21, %s1416_s24  ;;  %s1338_s24 = sshll.u32 %s1427_s17, 4  ;;  %s1339_s24 = int_to_ptr.vmem [resolvable:$false] %s1338_s24 }
 0x15d   : > { %p1341_p7 = scmp.lt.s32.totalorder %s1906_s21, %s1339_s24 }
 0x160   : > { %1204 = vrot.lane.b32.xlu0 %v1158_v20, %s1419_s29  ;;  %1214 = vrot.lane.b32.xlu1 %v1173_v21, %s1417_s26  ;;  %s1340_s26 = scalar_lea.vmem %s1339_s24, 512 }
 0x161   : > { %p1342_p9 = scmp.lt.s32.totalorder %s1340_s26, %s1334_s16 }
 0x163   : > { %p1343_p12 = por %p1342_p9, %p1341_p7 }
 0x164   : > { %1209 = vrot.lane.b32.xlu0 %v1158_v20, %s1420_s30  ;;  %1219 = vrot.lane.b32.xlu1 %v1173_v21, %s1418_s27 }
 0x165   : > { %p1344_p2 = pnand %p1343_p12, %p1337_p3 }
 0x168   : > { %1224 = vrot.lane.b32.xlu1 %v1173_v21, %s1419_s29  ;;  %592 = vperm.xlu0 %1233, %v1629_v3  }
 0x16c   : > { %1229 = vrot.lane.b32.xlu1 %v1173_v21, %s1420_s30 }
 0x170   : > { %596 = vperm.xlu1 %1234, %v1632_v5  }
 0x1be   : > { %v1160_v35 = vpop.permute.xlu0 %1159  ;;  %v1155_v36 = vpop.permute.xlu1 %1154 }
 0x1bf   : > { %v1157_v42 = vunpack.i.h.bf16 %v1155_v36  ;;  %v1156_v43 = vunpack.i.l.bf16 %v1155_v36  ;;  %v1162_v56 = vunpack.i.h.bf16 %v1160_v35  ;;  %v1161_v57 = vunpack.i.l.bf16 %v1160_v35 }
 0x1c2   : > { %v1165_v39 = vpop.permute.xlu0 %1164  ;;  %v1175_v40 = vpop.permute.xlu1 %1174 }
 0x1c3   : > { %v1177_v44 = vunpack.i.h.bf16 %v1175_v40  ;;  %v1176_v45 = vunpack.i.l.bf16 %v1175_v40  ;;  %v1167_v10 = vunpack.i.h.bf16 %v1165_v39  ;;  %v1166_v11 = vunpack.i.l.bf16 %v1165_v39 }
 0x1c5   : > { %v352_v47 = vsel %vm351_vm7, %v1156_v43, %v1176_v45  ;;  %v353_v48 = vsel %vm351_vm7, %v1157_v42, %v1177_v44  ;;  %v354_v49 = vsel %vm351_vm7, %v1176_v45, %v1156_v43  ;;  %v355_v50 = vsel %vm351_vm7, %v1177_v44, %v1157_v42  ;;  %vm1723_vm7 = vmand %vm336_vm3, %vm1688_vm13 }
 0x1c6   : > { %v1170_v51 = vpop.permute.xlu0 %1169  ;;  %v1180_v52 = vpop.permute.xlu1 %1179  ;;  %v1011_v53 = vpack.c.bf16 %v353_v48, %v352_v47  ;;  %v1014_v54 = vpack.c.bf16 %v355_v50, %v354_v49  ;;  %vm1024_vm3 = vmpackc.low %vm1723_vm7, %vm1723_vm7 }
 0x1c7   : > { %v1182_v58 = vunpack.i.h.bf16 %v1180_v52  ;;  %v1181_v59 = vunpack.i.l.bf16 %v1180_v52  ;;  %v1172_v24 = vunpack.i.h.bf16 %v1170_v51  ;;  %v1171_v25 = vunpack.i.l.bf16 %v1170_v51 }
 0x1c8   : > { %1013 = vmatprep.subr.msk.bf16.mxu1 %vm1012_vm10, %v1011_v53  ;;  %vm1030_vm10 = vmpackc.low %vm1655_vm4, %vm1655_vm4 }
 0x1c9   : > { %v380_v62 = vsel %vm378_vm11, %v1162_v56, %v1182_v58  ;;  %v382_v63 = vsel %vm378_vm11, %v1182_v58, %v1162_v56  ;;  %v379_v0 = vsel %vm378_vm11, %v1161_v57, %v1181_v59  ;;  %v381_v1 = vsel %vm378_vm11, %v1181_v59, %v1161_v57  ;;  %1016 = vmatpush1.bf16.msk.msra.mxu1 %vm1015_vm12, %v1014_v54  ;;  %vm1033_vm12 = vmpackc.low %vm1660_vm6, %vm1660_vm6 }
 0x1ca   : > { %v1017_v4 = vpack.c.bf16 %v380_v62, %v379_v0  ;;  %v1020_v6 = vpack.c.bf16 %v382_v63, %v381_v1  ;;  %v1195_v7 = vpop.permute.xlu0 %1194  ;;  %v1185_v8 = vpop.permute.xlu1 %1184  ;;  %vm459_vm11 = vcmp.lt.s32.totalorder %v1645_v27, 127 }
 0x1cb   : > { %v1187_v12 = vunpack.i.h.bf16 %v1185_v8  ;;  %v1186_v13 = vunpack.i.l.bf16 %v1185_v8  ;;  %v1197_v42 = vunpack.i.h.bf16 %v1195_v7  ;;  %v1196_v43 = vunpack.i.l.bf16 %v1195_v7 }
 0x1cc   : > { %1019 = vmatprep.subr.msk.bf16.mxu1 %vm1695_vm14, %v1017_v4  ;;  %vm338_vm14 = vcmp.lt.s32.totalorder %v1649_v32, 15 }
 0x1cd   : > { %v405_v15 = vsel %vm403_vm1, %v1167_v10, %v1187_v12  ;;  %v407_v16 = vsel %vm403_vm1, %v1187_v12, %v1167_v10  ;;  %v404_v17 = vsel %vm403_vm1, %v1166_v11, %v1186_v13  ;;  %v406_v18 = vsel %vm403_vm1, %v1186_v13, %v1166_v11  ;;  %1022 = vmatpush1.bf16.msk.msra.mxu1 %vm1714_vm0, %v1020_v6  ;;  %vm1040_vm1 = vmpackc.low %vm1688_vm13, %vm1688_vm13 }
 0x1ce   : > { %v1023_v19 = vpack.c.bf16 %v405_v15, %v404_v17  ;;  %v1026_v20 = vpack.c.bf16 %v407_v16, %v406_v18  ;;  %v1190_v21 = vpop.permute.xlu1 %1189  ;;  %v1200_v28 = vpop.permute.xlu0 %1199  ;;  %vm484_vm0 = vcmp.lt.s32.totalorder %v1645_v27, 113  ;;  %vm1767_vm7 = vmand %vm338_vm14, %vm1655_vm4 }
 0x1cf   : > { %v1192_v29 = vunpack.i.h.bf16 %v1190_v21  ;;  %v1191_v30 = vunpack.i.l.bf16 %v1190_v21  ;;  %v1202_v50 = vunpack.i.h.bf16 %v1200_v28  ;;  %v1201_v51 = vunpack.i.l.bf16 %v1200_v28  ;;  %vm1043_vm4 = vmpackc.low %vm1699_vm15, %vm1699_vm15 }
 0x1d0   : > { %1025 = vmatprep.subr.msk.bf16.mxu1 %vm1024_vm3, %v1023_v19  ;;  %vm511_vm3 = vcmp.lt.s32.totalorder %v1645_v27, 112 }
 0x1d1   : > { %v432_v31 = vsel %vm430_vm5, %v1172_v24, %v1192_v29  ;;  %v434_v33 = vsel %vm430_vm5, %v1192_v29, %v1172_v24  ;;  %v431_v35 = vsel %vm430_vm5, %v1171_v25, %v1191_v30  ;;  %v433_v36 = vsel %vm430_vm5, %v1191_v30, %v1171_v25  ;;  %1028 = vmatpush1.bf16.msk.msra.mxu1 %vm1027_vm9, %v1026_v20  ;;  %vm1046_vm5 = vmpackc.low %vm1767_vm7, %vm1767_vm7  ;;  %v217_v29 = vld [vmem:[#allocation6 + $0x8] sm:$0xff] }
 0x1d2   : > { %v1029_v39 = vpack.c.bf16 %v432_v31, %v431_v35  ;;  %v1032_v40 = vpack.c.bf16 %v434_v33, %v433_v36  ;;  %v1215_v41 = vpop.permute.xlu1 %1214  ;;  %v1205_v46 = vpop.permute.xlu0 %1204  ;;  %vm1797_vm9 = vmand %vm337_vm8, %vm1660_vm6  ;;  %v220_v30 = vld [vmem:[#allocation6 + $0x28] sm:$0xff]  ;;  %vm731_vm7 = vcmask 15360  }
 0x1d3   : > { %v1217_v44 = vunpack.i.h.bf16 %v1215_v41  ;;  %v1216_v45 = vunpack.i.l.bf16 %v1215_v41  ;;  %v1207_v59 = vunpack.i.h.bf16 %v1205_v46  ;;  %v1206_v62 = vunpack.i.l.bf16 %v1205_v46  ;;  %vm1817_vm6 = vmpackc.low %vm338_vm14, %vm338_vm14 }
 0x1d4   : > { %1031 = vmatprep.subr.msk.bf16.mxu1 %vm1030_vm10, %v1029_v39  ;;  %vm536_vm10 = vcmp.lt.s32.totalorder %v1645_v27, 111 }
 0x1d5   : > { %v463_v47 = vsel %vm459_vm11, %v1217_v44, %v1197_v42  ;;  %v462_v48 = vsel %vm459_vm11, %v1216_v45, %v1196_v43  ;;  %1034 = vmatpush1.bf16.msk.msra.mxu1 %vm1033_vm12, %v1032_v40  ;;  %v461_v56 = vsel %vm459_vm11, %v1197_v42, %v1217_v44  ;;  %vm1834_vm12 = vmand %vm338_vm14, %vm1688_vm13 }
 0x1d6   : > { %v1220_v49 = vpop.permute.xlu1 %1219  ;;  %1036 = vmatprep.subr.bf16.mxu1 %v1637_v22  ;;  %v460_v22 = vsel %vm459_vm11, %v1196_v43, %v1216_v45  ;;  %v1039_v57 = vpack.c.bf16 %v463_v47, %v462_v48  ;;  %v1210_v63 = vpop.permute.xlu0 %1209  ;;  %vm1049_vm11 = vmpackc.low %vm1797_vm9, %vm1797_vm9 }
 0x1d7   : > { %v1222_v52 = vunpack.i.h.bf16 %v1220_v49  ;;  %v1221_v53 = vunpack.i.l.bf16 %v1220_v49  ;;  %v1212_v10 = vunpack.i.h.bf16 %v1210_v63  ;;  %v1211_v12 = vunpack.i.l.bf16 %v1210_v63  ;;  %vm1055_vm13 = vmpackc.low %vm337_vm8, %vm337_vm8  ;;  %v216_v49 = vld [vmem:[#allocation6] ss:$0 sm:$0xff] }
 0x1d8   : > { %vm1058_vm14 = vmpackc.low %vm1834_vm12, %vm1834_vm12 }
 0x1d9   : > { %v488_v58 = vsel %vm484_vm0, %v1222_v52, %v1202_v50  ;;  %v487_v37 = vsel %vm484_vm0, %v1221_v53, %v1201_v51  ;;  %1038 = vmatpush1.bf16.msra.mxu1 %v1639_v23  ;;  %v1042_v23 = vpack.c.bf16 %v461_v56, %v460_v22  ;;  %v486_v4 = vsel %vm484_vm0, %v1202_v50, %v1222_v52 }
 0x1da   : > { %v1225_v60 = vpop.permute.xlu1 %1224  ;;  %1041 = vmatprep.subr.msk.bf16.mxu1 %vm1040_vm1, %v1039_v57  ;;  %v485_v6 = vsel %vm484_vm0, %v1201_v51, %v1221_v53  ;;  %v1045_v7 = vpack.c.bf16 %v488_v58, %v487_v37  ;;  %vm541_vm0 = vmand %vm337_vm8, %vm1699_vm15  ;;  %vm697_vm15 = vcmask 48160  }
 0x1db   : > { %v1227_v0 = vunpack.i.h.bf16 %v1225_v60  ;;  %v1226_v1 = vunpack.i.l.bf16 %v1225_v60  ;;  %v1048_v13 = vpack.c.bf16 %v486_v4, %v485_v6  ;;  %vm1061_vm1 = vmpackc.low %vm541_vm0, %vm541_vm0 }
 0x1dd   : > { %v515_v8 = vsel %vm511_vm3, %v1227_v0, %v1207_v59  ;;  %v514_v9 = vsel %vm511_vm3, %v1226_v1, %v1206_v62  ;;  %1044 = vmatpush1.bf16.msk.msra.mxu1 %vm1043_vm4, %v1042_v23  ;;  %v513_v17 = vsel %vm511_vm3, %v1207_v59, %v1227_v0  ;;  %v512_v18 = vsel %vm511_vm3, %v1206_v62, %v1226_v1 }
 0x1de   : > { %v1230_v11 = vpop.permute.xlu1 %1229  ;;  %1047 = vmatprep.subr.msk.bf16.mxu1 %vm1046_vm5, %v1045_v7  ;;  %v1051_v19 = vpack.c.bf16 %v515_v8, %v514_v9  ;;  %v1054_v32 = vpack.c.bf16 %v513_v17, %v512_v18  ;;  %v714_v23 = vshrl.u32 %v326_v26, 7 }
 0x1df   : > { %v1232_v14 = vunpack.i.h.bf16 %v1230_v11  ;;  %v1231_v15 = vunpack.i.l.bf16 %v1230_v11 }
 0x1e0   : > { %v715_v2 = vsub.s32 0, %v714_v23 }
 0x1e1   : > { %v540_v20 = vsel %vm536_vm10, %v1232_v14, %v1212_v10  ;;  %v539_v21 = vsel %vm536_vm10, %v1231_v15, %v1211_v12  ;;  %1050 = vmatpush1.bf16.msk.msra.mxu1 %vm1049_vm11, %v1048_v13  ;;  %v538_v55 = vsel %vm536_vm10, %v1212_v10, %v1232_v14  ;;  %v537_v24 = vsel %vm536_vm10, %v1211_v12, %v1231_v15 }
 0x1e2   : > { %1053 = vmatprep.subr.msk.bf16.mxu1 %vm1817_vm6, %v1051_v19  ;;  %v1057_v25 = vpack.c.bf16 %v540_v20, %v539_v21  ;;  %v1060_v28 = vpack.c.bf16 %v538_v55, %v537_v24  ;;  %v1425_v13 = vmov 10  }
 0x1e3   : > { %1235 = vset.pattern.permute.xlu0 %v1425_v13  ;;  %1236 = vset.pattern.permute.xlu1 %v1425_v13 }
 0x1e5   : > { %1056 = vmatpush1.bf16.msk.msra.mxu1 %vm1055_vm13, %v1054_v32 }
 0x1e6   : > { %1059 = vmatprep.subr.msk.bf16.mxu1 %vm1058_vm14, %v1057_v25 }
 0x1e7   : > { %v593_v34 = vpop.permute.xlu0 %592 }
 0x1e9   : > { %1062 = vmatpush1.bf16.msk.msra.mxu1 %vm1061_vm1, %v1060_v28  ;;  %v221_v28 = vld [vmem:[#allocation8] sm:$0xff] }
 0x1ec   : > { %671 = vmatmul.mubr.f32.vlgmr.msra.gmra.mrb[0].mxu1 %v217_v29  ;;  %v1426_v29 = vmov 16  }
 0x1ed   : > { %968 = vmatprep.mubr.msk.f32.mxu1 %vm599_vm2, %v220_v30 }
 0x1ef   : > { %v597_v36 = vpop.permute.xlu1 %596 }
 0x1f0   : > { %677 = vmatmul.mubr.f32.gmra.mrb[2].mxu1 %v219_v61 }
 0x2bf   : > { %v672_v31 = vpop.f32.mrb[0].mxu1 }
 0x2c0   : > { %v1863_v33 = vadd.f32 %v672_v31, %v593_v34  ;;  %v674_v35 = vpop.f32.mrb[1].mxu1 }
 0x2c1   : > { %v1865_v27 = vadd.f32 %v674_v35, %v593_v34 }
 0x2c2   : > { %v683_v39 = vmax.f32 %v1863_v33, 0.0 }
 0x2c3   : > { %v684_v40 = vmax.f32 %v1865_v27, 0.0  ;;  %v678_v41 = vpop.f32.mrb[2].mxu1 }
 0x2c4   : > { %v1869_v42 = vadd.f32 %v678_v41, %v597_v36  ;;  %v680_v43 = vpop.f32.mrb[3].mxu1 }
 0x2c5   : > { %v1871_v44 = vadd.f32 %v680_v43, %v597_v36  ;;  %v687_v45 = vadd.f32 %v684_v40, %v683_v39 }
 0x2c6   : > { %v685_v46 = vmax.f32 %v1869_v42, 0.0 }
 0x2c7   : > { %v686_v47 = vmax.f32 %v1871_v44, 0.0  ;;  %688 = vadd.xlane.f32.xlu1 %v687_v45 }
 0x2c9   : > { %v690_v48 = vadd.f32 %v686_v47, %v685_v46 }
 0x2cb   : > { %691 = vadd.xlane.f32.xlu0 %v690_v48 }
 0x2e1   : > { %708 = vrot.lane.b32.xlu0 %v216_v49, %s1422_s23 }
 0x354   : > { %v689_v50 = vpop.xlane.xlu1 %688 }
 0x355   : > { %v693_v51 = vmul.f32 0.00390625, %v689_v50 }
 0x357   : > { %v695_v53 = vmul.f32 %v693_v51, %v1629_v3 }
 0x358   : > { %v692_v52 = vpop.xlane.xlu0 %691 }
 0x359   : > { %v694_v54 = vmul.f32 0.00390625, %v692_v52  ;;  %v698_v22 = vsel %vm697_vm15, %v695_v53, 0.0 }
 0x35b   : > { %v696_v56 = vmul.f32 %v694_v54, %v1632_v5 }
 0x35c   : > { %v709_v0 = vpop.permute.xlu0 %708 }
 0x35d   : > { %v699_v57 = vsel %vm697_vm15, %v696_v56, 0.0 }
 0x35e   : > { %v700_v58 = vadd.f32 %v699_v57, %v698_v22 }
 0x360   : > { %v701_v37 = vrot.slane %v700_v58, 4 }
 0x362   : > { %v702_v59 = vadd.f32 %v701_v37, %v700_v58 }
 0x364   : > { %v703_v60 = vrot.slane %v702_v59, 2 }
 0x366   : > { %v704_v62 = vadd.f32 %v703_v60, %v702_v59 }
 0x368   : > { %v705_v63 = vrot.slane %v704_v62, 1 }
 0x36a   : > { %v706_v1 = vadd.f32 %v705_v63, %v704_v62 }
 0x36c   : > { %v711_v4 = vadd.f32 %v709_v0, %v706_v1 }
 0x36e   : > { %v712_v6 = vmax.f32 %v711_v4, 0.0 }
 0x370   : > { %v716_v7 = vrot.slane %v712_v6, %v715_v2 }
 0x372   : > { %718 = vrot.lane.b32.xlu1 %v716_v7, %s1423_s5 }
 0x3e4   : > { %v719_v8 = vpop.permute.xlu1 %718 }
 0x3e5   : > { %v721_v9 = vmul.f32 %v719_v8, %v1629_v3  ;;  %v722_v38 = vmul.f32 %v719_v8, %v1632_v5 }
 0x3e7   : > { %727 = vrot.lane.b32.xlu0 %v722_v38, %s1424_s8  ;;  %725 = vrot.lane.b32.xlu1 %v721_v9, %s1424_s8 }
 0x459   : > { %v728_v10 = vpop.permute.xlu0 %727  ;;  %v726_v26 = vpop.permute.xlu1 %725 }
 0x45a   : > { %v735_v11 = vsel %vm731_vm7, %v728_v10, 0.0  ;;  %v732_v12 = vsel %vm731_vm7, %v726_v26, 0.0 }
 0x45b   : > { %736 = vadd.xlane.f32.xlu0 %v735_v11  ;;  %733 = vadd.xlane.f32.xlu1 %v732_v12 }
 0x4e8   : > { %v737_v14 = vpop.xlane.xlu0 %736  ;;  %v734_v15 = vpop.xlane.xlu1 %733 }
 0x4e9   : > { %v739_v16 = vadd.f32 %v737_v14, %v1632_v5  ;;  %v738_v17 = vadd.f32 %v734_v15, %v1629_v3 }
 0x4eb   : > { %v970_v18 = vmul.f32 -1.442695, %v739_v16  ;;  %v969_v19 = vmul.f32 -1.442695, %v738_v17 }
 0x4ed   : > { %1240 = vpow2.f32 %v970_v18 }
 0x4ee   : > { %1242 = vpow2.f32 %v969_v19 }
 0x4f7   : > { %v1241_v20 = vpop.eup %1240 }
 0x4f8   : > { %v1243_v21 = vpop.eup %1242  ;;  %v747_v32 = vadd.f32 1.0, %v1241_v20 }
 0x4f9   : > { %v746_v55 = vadd.f32 1.0, %v1243_v21 }
 0x4fa   : > { %1244 = vrcp.f32 %v747_v32 }
 0x4fb   : > { %1246 = vrcp.f32 %v746_v55 }
 0x504   : > { %v1245_v24 = vpop.eup %1244 }
 0x505   : > { %v1247_v25 = vpop.eup %1246  ;;  %759 = vperm.xlu1 %1236, %v1245_v24  }
 0x506   : > { %754 = vperm.xlu0 %1235, %v1247_v25  }
 0x509   : > { %1237 = vset.pattern.permute.xlu1 %v1426_v29 }
 0x50a   : > { %1238 = vset.pattern.permute.xlu0 %v1426_v29  ;;  %768 = vperm.xlu1 %1237, %v221_v28  }
 0x584   : > { %v760_v3 = vpop.permute.xlu1 %759 }
 0x585   : > { %v755_v5 = vpop.permute.xlu0 %754  ;;  %v764_v30 = vmul.f32 %v760_v3, %v685_v46  ;;  %v765_v61 = vmul.f32 %v760_v3, %v686_v47 }
 0x586   : > { %v762_v34 = vmul.f32 %v755_v5, %v683_v39  ;;  %v763_v31 = vmul.f32 %v755_v5, %v684_v40 }
 0x588   : > { %v1063_v35 = vpack.c.bf16 %v765_v61, %v763_v31  ;;  %v1065_v36 = vpack.c.bf16 %v764_v30, %v762_v34 }
 0x589   : > { %v769_v41 = vpop.permute.xlu1 %768 }
 0x58a   : > { %1064 = vmatprep.subr.bf16.mxu0 %v1063_v35 }
 0x58b   : > { %1066 = vmatpush1.bf16.msra.mxu0 %v1065_v36 }
 0x58e   : > { %971 = vmatmul.mubr.msk.f32.vlgmr.msra.gmra.mrb[4].mxu0 %vm599_vm2, %v221_v28 }
 0x661   : > { %v839_v42 = vpop.f32.mrb[4].mxu0 }
 0x662   : > { %v841_v43 = vpop.f32.mrb[5].mxu0  ;;  %v840_v33 = vadd.f32 %v839_v42, %v769_v41 }
 0x663   : > { %v842_v39 = vadd.f32 %v841_v43, %v769_v41 }
 0x664   : > { %844 = vst [vmem:[%s213_s10] sm:$0xff] %v840_v33 }
 0x665   : > { %845 = vst [vmem:[%s213_s10 + $0x8] sm:$0xff] %v842_v39 }
 0x666   : > { %1347 = shalt.err (!%p1344_p2)
}
 0x667   : > { %s1348_s11 = scalar_lea.hbm %s1904_s18, 256  ;;  %s1352_s30 = scalar_lea.hbm %s1951_s3, 512 }
 0x668   : > { %p1349_p13 = scmp.ne.s32.totalorder %s1904_s18, %s1348_s11  ;;  %p1353_p4 = scmp.lt.u32.totalorder %s1904_s18, %s1951_s3 }
 0x669   : > { %p1354_p5 = scmp.lt.u32.totalorder %s1352_s30, %s1348_s11  ;;  %p1356_p8 = scmp.lt.u32.totalorder %s1348_s11, %s1904_s18 }
 0x66a   : > { %p1350_p6 = pnand %p1349_p13, %p1993_p0 }
 0x66b   : > { %p1355_p11 = por %p1354_p5, %p1353_p4 }
 0x66c   : > { %p1351_p10 = pneg %p1350_p6 }
 0x66d   : > { %p1357_p1 = por %p1356_p8, %p1355_p11 }
 0x66f   : > { %p1358_p3 = pnand %p1357_p1, %p1351_p10 }
 0x671   : > { %1361 = shalt.err (!%p1358_p3)
}
 0x672   : > { %1077 = dma.vmem_to_hbm [thread:$0]  (%p1993_p0), %s1906_s21, 256, %s1904_s18, %s847_s20  }
 0x673 PF: > { %s873_s8 = sand.u32 1, %s1392_s12   ;;  %p1994_p7 = scmp.ne.s32.totalorder %s1956_s19, 0 }
 0x674   : > { %p1995_p9 = scmp.ge.s32.totalorder %s1404_s15, 2  ;;  %s874_s9 = scalar_lea.sflag [#allocation5], %s873_s8 }
 0x676   : > { %p1091_p12 = pnand %p1995_p9, %p1994_p7 }
 0x678   : > { %1387 = dma.done.wait (!%p1091_p12), %s874_s9, 256  }
 0x679   : > { %1389 = vsyncadd (!%p1091_p12), %s874_s9, 4294967040  ;;  %p17_p2 = scmp.ge.s32.totalorder %s1558_s4, 4   ;;  %s1996_s12 = smov %s1396_s13 }
 0x67a   : > { %s1997_s13 = smov %s1400_s14  ;;  %s1998_s14 = smov %s1574_s7 }
 0x67b   : > { %s1999_s15 = smov %s1558_s4  ;;  %19 = sbr.rel (!%p17_p2) target bundleno = 6 (0x6), region = 85 }
 0x682   :  { %879 = vsyncpa [#allocation4], 1 }
 0x683   :  { %881 = vsyncpa [#allocation4 + $0x1], 1 }
 0x684   :  { %882 = vsyncpa [#allocation7], 1 }
 0x685   :  { %883 = vsyncpa [#allocation5], 1 }
 0x686   :  { %885 = vsyncpa [#allocation5 + $0x1], 1 }

</bundles_post_ra>
